<compile_context>
chip_gen: v5e
topology: v5e:2x2
jax: 0.10.0
libtpu: 0.0.40
codegen_flags: <defaults>
</compile_context>

<pallas_src>
import jax
import jax.numpy as jnp
from jax.experimental import pallas as pl
from jax.experimental.pallas import tpu as pltpu

# Model dims (X_train.shape[1] is undefined in the source snippet; use a small
# synthetic feature count consistent with an "income" tabular dataset).
N_FEATURES = 12
H1 = 50
H2 = 20
OUT = 1

_TM_MAX = 8192          # rows per batch tile on the multi-tile path
_SINGLE_TILE_MAX = 256  # batches up to this size run as one full-extent block


def _round_up(n, m):
    return ((n + m - 1) // m) * m


def _mlp_kernel(x_ref, w1_ref, b1_ref, w2_ref, b2_ref, w3_ref, b3_ref, o_ref):
    """Fused 3-layer MLP forward for one batch tile, all operands in VMEM."""
    x = x_ref[...]                                                     # (TM, F)

    # Layer 1: Linear(F, 50) + ReLU  (MXU; K=12 is lane-sparse but the kernel
    # is HBM-bound on the x stream, so MXU utilization is irrelevant here).
    h1 = jnp.dot(x, w1_ref[...], preferred_element_type=jnp.float32)   # (TM, 50)
    h1 = jnp.maximum(h1 + b1_ref[...], 0.0)

    # Layer 2: Linear(50, 20) + ReLU  (MXU).
    h2 = jnp.dot(h1, w2_ref[...], preferred_element_type=jnp.float32)  # (TM, 20)
    h2 = jnp.maximum(h2 + b2_ref[...], 0.0)

    # Layer 3: Linear(20, 1).  K=20, N=1 -> keep it off the MXU: VPU
    # broadcast-multiply against the (1, 20) weight row + XLU lane reduce.
    # The (TM,) -> (1, TM) relayout keeps the output store lane-dense; its
    # XLU cost hides under the memory-bound x stream.
    z = jnp.sum(h2 * w3_ref[...], axis=-1)                              # (TM,)
    z = z[None, :] + b3_ref[...]                                        # (1, TM)

    # Sigmoid: exp and reciprocal both run on the EUP.  approx=True carries
    # ~1e-3 relative error (well inside the 5e-3 test tolerance); swap to an
    # exact division if downstream thresholds/calibration are sensitive.
    o_ref[...] = pl.reciprocal(1.0 + jnp.exp(-z), approx=True).astype(o_ref.dtype)


def income_predictor_forward(x, params, *, tm_max=_TM_MAX):
    """Run the fused MLP kernel. x: (B, N_FEATURES) float32 -> (B, 1) float32."""
    w1, b1, w2, b2, w3, b3 = params
    batch, feat = x.shape

    if batch <= _SINGLE_TILE_MAX:
        # One full-extent block: block dims == array dims, so the (8, 128)
        # divisibility rule is satisfied with no padding at any batch size.
        tm = batch
    else:
        # Multi-tile path: tm must be a multiple of 128 so the (1, tm) output
        # blocks are unmasked lane-dense stores.  Force >= 2 tiles so the
        # ("parallel",) batch axis can shard across both v7x TensorCores.
        # The last tile may be ragged; Pallas edge-block handling masks the
        # out-of-bounds reads/writes, so no wrapper jnp.pad (and no extra HBM
        # pass over x) is needed.
        tm = min(tm_max, _round_up(pl.cdiv(batch, 2), 128))
    num_tiles = pl.cdiv(batch, tm)

    # Weights/biases: one full block each, constant index_map -> fetched once
    # and kept VMEM-resident across all grid steps.
    resident = lambda a: pl.BlockSpec(a.shape, lambda i: (0,) * a.ndim)

    out = pl.pallas_call(
        _mlp_kernel,
        out_shape=jax.ShapeDtypeStruct((1, batch), jnp.float32),
        grid=(num_tiles,),
        in_specs=[
            pl.BlockSpec((tm, feat), lambda i: (i, 0)),   # x: streamed per tile
            resident(w1), resident(b1),
            resident(w2), resident(b2),
            resident(w3), resident(b3),
        ],
        # Lane-dense output: tile i writes columns [i*tm, (i+1)*tm) (clipped
        # at the ragged edge by the pipeline's masked write-back).
        out_specs=pl.BlockSpec((1, tm), lambda i: (0, i)),
        compiler_params=pltpu.CompilerParams(
            dimension_semantics=("parallel",),   # megacore split on v7x
            vmem_limit_bytes=64 << 20,           # v5e's 16 MiB default is too small
        ),
    )(x, w1, b1, w2, b2, w3, b3)

    return out.reshape(batch, OUT)


def init_params(key):
    """Deterministic synthetic parameters (PyTorch-like uniform fan-in init)."""
    ks = jax.random.split(key, 6)

    def uniform(k, shape, fan_in):
        bound = fan_in ** -0.5
        return jax.random.uniform(k, shape, jnp.float32, -bound, bound)

    w1 = uniform(ks[0], (N_FEATURES, H1), N_FEATURES)   # (in, out)
    b1 = uniform(ks[1], (1, H1), N_FEATURES)
    w2 = uniform(ks[2], (H1, H2), H1)                   # (in, out)
    b2 = uniform(ks[3], (1, H2), H1)
    w3 = uniform(ks[4], (1, H2), H2)                    # PyTorch (out, in) row
    b3 = uniform(ks[5], (1, 1), H2)
    return (w1, b1, w2, b2, w3, b3)


def reference_forward(x, params):
    """Pure-JAX reference for the correctness check."""
    w1, b1, w2, b2, w3, b3 = params
    h1 = jnp.maximum(x @ w1 + b1, 0.0)
    h2 = jnp.maximum(h1 @ w2 + b2, 0.0)
    return jax.nn.sigmoid(h2 @ w3.T + b3)


if __name__ == "__main__":
    key = jax.random.PRNGKey(0)
    k_params, k_x1, k_x2 = jax.random.split(key, 3)
    params = init_params(k_params)

    # Small batch: single full-extent block (no padding, no grid overhead).
    x_small = jax.random.normal(k_x1, (8, N_FEATURES), jnp.float32)
    out_small = jax.block_until_ready(income_predictor_forward(x_small, params))
    ref_small = reference_forward(x_small, params)
    assert out_small.shape == (8, OUT)
    assert jnp.allclose(out_small, ref_small, atol=5e-3, rtol=5e-3), \
        "small-batch mismatch vs reference"

    # Moderate batch not divisible by the tile: exercises the multi-tile path
    # (2 tiles of 640 rows), a ragged last edge block, and no wrapper padding.
    x_big = jax.random.normal(k_x2, (1040, N_FEATURES), jnp.float32)
    out_big = jax.block_until_ready(income_predictor_forward(x_big, params))
    ref_big = reference_forward(x_big, params)
    assert out_big.shape == (1040, OUT)
    assert jnp.allclose(out_big, ref_big, atol=5e-3, rtol=5e-3), \
        "tiled-batch mismatch vs reference"

    print("KERNEL_OK")
</pallas_src>

<mosaic_0001>
module attributes {stable_mosaic.version = 11 : i64} {
  func.func @_mlp_kernel(%arg0: i32, %arg1: memref<8x12xf32, #tpu.memory_space<vmem>>, %arg2: memref<12x50xf32, #tpu.memory_space<vmem>>, %arg3: memref<1x50xf32, #tpu.memory_space<vmem>>, %arg4: memref<50x20xf32, #tpu.memory_space<vmem>>, %arg5: memref<1x20xf32, #tpu.memory_space<vmem>>, %arg6: memref<1x20xf32, #tpu.memory_space<vmem>>, %arg7: memref<1x1xf32, #tpu.memory_space<vmem>>, %arg8: memref<1x8xf32, #tpu.memory_space<vmem>>) attributes {dimension_semantics = [#tpu.dimension_semantics<parallel>], iteration_bounds = array<i64: 1>, scalar_prefetch = 0 : i64, scratch_operands = 0 : i64, tpu.core_type = #tpu.core_type<tc>, window_params = [{transform_indices = @transform_0, window_bounds = array<i64: 8, 12>}, {pipeline_mode = #tpu.pipeline_mode<synchronous>, transform_indices = @transform_1, window_bounds = array<i64: 12, 50>}, {pipeline_mode = #tpu.pipeline_mode<synchronous>, transform_indices = @transform_2, window_bounds = array<i64: 1, 50>}, {pipeline_mode = #tpu.pipeline_mode<synchronous>, transform_indices = @transform_3, window_bounds = array<i64: 50, 20>}, {pipeline_mode = #tpu.pipeline_mode<synchronous>, transform_indices = @transform_4, window_bounds = array<i64: 1, 20>}, {pipeline_mode = #tpu.pipeline_mode<synchronous>, transform_indices = @transform_5, window_bounds = array<i64: 1, 20>}, {pipeline_mode = #tpu.pipeline_mode<synchronous>, transform_indices = @transform_6, window_bounds = array<i64: 1, 1>}, {transform_indices = @transform_7, window_bounds = array<i64: 1, 8>}]} {
    %c0 = arith.constant 0 : index
    %c0_0 = arith.constant 0 : index
    %0 = vector.load %arg1[%c0, %c0_0] : memref<8x12xf32, #tpu.memory_space<vmem>>, vector<8x12xf32>
    %c0_1 = arith.constant 0 : index
    %c0_2 = arith.constant 0 : index
    %1 = vector.load %arg2[%c0_1, %c0_2] : memref<12x50xf32, #tpu.memory_space<vmem>>, vector<12x50xf32>
    %cst = arith.constant dense<0.000000e+00> : vector<8x50xf32>
    %2 = tpu.matmul %0, %1, %cst {dimension_numbers = #tpu.dot_dimension_numbers<[1], [0], [0], [1], [0, 0, 1, 1], [], []>} : vector<8x12xf32>, vector<12x50xf32>, vector<8x50xf32> -> vector<8x50xf32>
    %c0_3 = arith.constant 0 : index
    %c0_4 = arith.constant 0 : index
    %3 = vector.load %arg3[%c0_3, %c0_4] : memref<1x50xf32, #tpu.memory_space<vmem>>, vector<1x50xf32>
    %4 = vector.broadcast %3 : vector<1x50xf32> to vector<8x50xf32>
    %5 = arith.addf %2, %4 : vector<8x50xf32>
    %cst_5 = arith.constant 0.000000e+00 : f32
    %6 = vector.broadcast %cst_5 : f32 to vector<8x50xf32>
    %7 = arith.maximumf %5, %6 : vector<8x50xf32>
    %c0_6 = arith.constant 0 : index
    %c0_7 = arith.constant 0 : index
    %8 = vector.load %arg4[%c0_6, %c0_7] : memref<50x20xf32, #tpu.memory_space<vmem>>, vector<50x20xf32>
    %cst_8 = arith.constant dense<0.000000e+00> : vector<8x20xf32>
    %9 = tpu.matmul %7, %8, %cst_8 {dimension_numbers = #tpu.dot_dimension_numbers<[1], [0], [0], [1], [0, 0, 1, 1], [], []>} : vector<8x50xf32>, vector<50x20xf32>, vector<8x20xf32> -> vector<8x20xf32>
    %c0_9 = arith.constant 0 : index
    %c0_10 = arith.constant 0 : index
    %10 = vector.load %arg5[%c0_9, %c0_10] : memref<1x20xf32, #tpu.memory_space<vmem>>, vector<1x20xf32>
    %11 = vector.broadcast %10 : vector<1x20xf32> to vector<8x20xf32>
    %12 = arith.addf %9, %11 : vector<8x20xf32>
    %cst_11 = arith.constant 0.000000e+00 : f32
    %13 = vector.broadcast %cst_11 : f32 to vector<8x20xf32>
    %14 = arith.maximumf %12, %13 : vector<8x20xf32>
    %c0_12 = arith.constant 0 : index
    %c0_13 = arith.constant 0 : index
    %15 = vector.load %arg6[%c0_12, %c0_13] : memref<1x20xf32, #tpu.memory_space<vmem>>, vector<1x20xf32>
    %16 = vector.broadcast %15 : vector<1x20xf32> to vector<8x20xf32>
    %17 = arith.mulf %14, %16 : vector<8x20xf32>
    %cst_14 = arith.constant dense<0.000000e+00> : vector<8xf32>
    %18 = vector.multi_reduction <add>, %17, %cst_14 [1] : vector<8x20xf32> to vector<8xf32>
    %19 = vector.shape_cast %18 : vector<8xf32> to vector<1x8xf32>
    %c0_15 = arith.constant 0 : index
    %c0_16 = arith.constant 0 : index
    %20 = vector.load %arg7[%c0_15, %c0_16] : memref<1x1xf32, #tpu.memory_space<vmem>>, vector<1x1xf32>
    %21 = vector.broadcast %20 : vector<1x1xf32> to vector<1x8xf32>
    %22 = arith.addf %19, %21 : vector<1x8xf32>
    %cst_17 = arith.constant 0.000000e+00 : f32
    %23 = vector.broadcast %cst_17 : f32 to vector<1x8xf32>
    %24 = arith.subf %23, %22 : vector<1x8xf32>
    %25 = math.exp %24 : vector<1x8xf32>
    %cst_18 = arith.constant 1.000000e+00 : f32
    %26 = vector.broadcast %cst_18 : f32 to vector<1x8xf32>
    %27 = arith.addf %26, %25 : vector<1x8xf32>
    %28 = tpu.reciprocal %27 {approx = true} : vector<1x8xf32> -> vector<1x8xf32>
    %c0_19 = arith.constant 0 : index
    %c0_20 = arith.constant 0 : index
    %29 = vector.load %arg8[%c0_19, %c0_20] : memref<1x8xf32, #tpu.memory_space<vmem>>, vector<1x8xf32>
    tpu.vector_store %arg8[%c0_19, %c0_20], %28 {strides = array<i32>} : memref<1x8xf32, #tpu.memory_space<vmem>>, vector<1x8xf32>,
    return
  }
  func.func @transform_0(%arg0: i32) -> (i32, i32) {
    %c0_i32 = arith.constant 0 : i32
    %c0_i32_0 = arith.constant 0 : i32
    return %arg0, %c0_i32 : i32, i32
  }
  func.func @transform_1(%arg0: i32) -> (i32, i32) {
    %c0_i32 = arith.constant 0 : i32
    %c0_i32_0 = arith.constant 0 : i32
    %c0_i32_1 = arith.constant 0 : i32
    return %c0_i32, %c0_i32_0 : i32, i32
  }
  func.func @transform_2(%arg0: i32) -> (i32, i32) {
    %c0_i32 = arith.constant 0 : i32
    %c0_i32_0 = arith.constant 0 : i32
    %c0_i32_1 = arith.constant 0 : i32
    return %c0_i32, %c0_i32_0 : i32, i32
  }
  func.func @transform_3(%arg0: i32) -> (i32, i32) {
    %c0_i32 = arith.constant 0 : i32
    %c0_i32_0 = arith.constant 0 : i32
    %c0_i32_1 = arith.constant 0 : i32
    return %c0_i32, %c0_i32_0 : i32, i32
  }
  func.func @transform_4(%arg0: i32) -> (i32, i32) {
    %c0_i32 = arith.constant 0 : i32
    %c0_i32_0 = arith.constant 0 : i32
    %c0_i32_1 = arith.constant 0 : i32
    return %c0_i32, %c0_i32_0 : i32, i32
  }
  func.func @transform_5(%arg0: i32) -> (i32, i32) {
    %c0_i32 = arith.constant 0 : i32
    %c0_i32_0 = arith.constant 0 : i32
    %c0_i32_1 = arith.constant 0 : i32
    return %c0_i32, %c0_i32_0 : i32, i32
  }
  func.func @transform_6(%arg0: i32) -> (i32, i32) {
    %c0_i32 = arith.constant 0 : i32
    %c0_i32_0 = arith.constant 0 : i32
    %c0_i32_1 = arith.constant 0 : i32
    return %c0_i32, %c0_i32_0 : i32, i32
  }
  func.func @transform_7(%arg0: i32) -> (i32, i32) {
    %c0_i32 = arith.constant 0 : i32
    %c0_i32_0 = arith.constant 0 : i32
    return %c0_i32, %arg0 : i32, i32
  }
}

</mosaic_0001>

<bundles_post_ra>
// kernel: tpu_custom_call.1
= control target key start
LH: loop header
LB: loop body
LE: loop exit
PB: predicated region body
PF: predicated region fallthrough
CT: control target
= control target key end

     0   :  { %s277_s0 = inlined_call_operand.vmem [shape: f32[8,12], index: 0, kind: input, shape index: {}]   ;;  %s278_s1 = inlined_call_operand.vmem [shape: f32[12,50], index: 1, kind: input, shape index: {}]   ;;  %s279_s2 = inlined_call_operand.vmem [shape: f32[1,50], index: 2, kind: input, shape index: {}]   ;;  %s280_s3 = inlined_call_operand.vmem [shape: f32[50,20], index: 3, kind: input, shape index: {}]   ;;  %s281_s4 = inlined_call_operand.vmem [shape: f32[1,20], index: 4, kind: input, shape index: {}]   ;;  %s282_s5 = inlined_call_operand.vmem [shape: f32[1,20], index: 5, kind: input, shape index: {}]   ;;  %s283_s6 = inlined_call_operand.<no memory space> [shape: f32[1,1], index: 6, kind: input, shape index: {}]   ;;  %s284_s7 = inlined_call_operand.hbm [shape: f32[1,8], index: 7, kind: output, shape index: {}]  }
   0x1   :  { %v12_v0 = vstv %s283_s6 }
   0x2   :  { %13 = vst [vmem:[#allocation2] sm:$0x1] %v12_v0 }
   0x3   :  { %v31_v1 = vld [vmem:[%s278_s1 + $0x8] sm:$0xf]  ;;  %vm40_vm0 = vcmask 1043456   ;;  %v30_v2 = vld [vmem:[%s278_s1] sm:$0xff]  ;;  %vm36_vm1 = vcmask 97280   ;;  %vm80_vm2 = vcmask 1041408  }
   0x4   :  { %150 = vmatpush.msk.msra.mxu0 %vm40_vm0, %v31_v1  ;;  %v29_v3 = vld [vmem:[%s277_s0] sm:$0xff]  ;;  %v71_v4 = vld [vmem:[%s280_s3 + $0x30] sm:$0x3]  ;;  %v70_v5 = vld [vmem:[%s280_s3 + $0x28] sm:$0xff] }
   0x5   :  { %152 = vmatpush.msk.msra.mxu1 %vm80_vm2, %v71_v4  ;;  %v69_v6 = vld [vmem:[%s280_s3 + $0x20] sm:$0xff] }
   0x6   :  { %59 = vmatpush.msra.mxu0 %v30_v2 }
   0x7   :  { %14 = vsyncpa [#allocation4], 0  ;;  %151 = vmatmul.msk.f32.vlgmr.msra.gmra.mxu0 %vm36_vm1, %v29_v3  ;;  %94 = vmatpush.msra.mxu1 %v70_v5  ;;  %v68_v7 = vld [vmem:[%s280_s3 + $0x18] sm:$0xff]  ;;  %v67_v8 = vld [vmem:[%s280_s3 + $0x10] sm:$0xff]  ;;  %v190_v12 = vmov 0   ;;  %vm76_vm3 = vcmask 408576   ;;  %v128_v32 = vlaneseq }
   0x8   :  { %v66_v9 = vld [vmem:[%s280_s3 + $0x8] sm:$0xff]  ;;  %v65_v10 = vld [vmem:[%s280_s3] sm:$0xff]  ;;  %156 = vset.pattern.permute.xlu0 %v190_v12  ;;  %vm110_vm4 = vcmask 162816   ;;  %s141_s26 = sshll.u32 %s284_s7, 4  ;;  %vm132_vm5 = vcmask 57344   ;;  %s142_s26 = int_to_ptr.hbm [resolvable:$true] %s141_s26 }
   0x9   :  { %95 = vmatpush.msra.mxu1 %v69_v6  ;;  %v114_v11 = vld [vmem:[#allocation2] sm:$0x1]  ;;  %v129_v33 = vand.u32 127, %v128_v32 }
   0xa   :  { %117 = vperm.xlu0 %156, %v114_v11   ;;  %v157_v13 = vld [vmem:[%s279_s2] ss:$0 sm:$0xff]  ;;  %s191_s2 = smov [#allocation3]  }
   0xb   :  { %96 = vmatpush.msra.mxu1 %v68_v7  ;;  %v158_v17 = vld [vmem:[%s281_s4] ss:$0 sm:$0xff]  ;;  %s139_s4 = sshll.u32 %s191_s2, 4  ;;  %s140_s4 = int_to_ptr.vmem [resolvable:$true] %s139_s4 }
   0xc   :  { %v159_v20 = vld [vmem:[%s282_s5] ss:$0 sm:$0xff] }
   0xd   :  { %97 = vmatpush.msra.mxu1 %v67_v8 }
   0xf   :  { %98 = vmatpush.msra.mxu1 %v66_v9 }
  0x11   :  { %99 = vmatpush.msra.mxu1 %v65_v10 }
  0x7c   :  { %v118_v24 = vpop.permute.xlu0 %117 }
  0x7d   :  { %v120_v25 = vperm.slane %v118_v24, 0 }
  0x84   :  { %v61_v14 = vpop.f32.mrf.mxu0 }
  0x85   :  { %v62_v15 = vadd.f32 %v157_v13, %v61_v14 }
  0x87   :  { %v64_v16 = vmax.f32 %v62_v15, 0.0 }
  0x89   :  { %153 = vmatmul.msk.f32.vlgmr.msra.gmra.mxu1 %vm76_vm3, %v64_v16 }
 0x106   :  { %v101_v18 = vpop.f32.mrf.mxu1 }
 0x107   :  { %v102_v19 = vadd.f32 %v158_v17, %v101_v18 }
 0x109   :  { %v104_v21 = vmax.f32 %v102_v19, 0.0 }
 0x10b   :  { %v109_v22 = vmul.f32 %v159_v20, %v104_v21 }
 0x10d   :  { %v111_v23 = vsel %vm110_vm4, %v109_v22, 0.0 }
 0x10e   :  { %112 = vadd.xlane.f32.xlu0 %v111_v23 }
 0x181   :  { %v113_v26 = vpop.xlane.xlu0 %112 }
 0x182   :  { %v121_v27 = vadd.f32 %v120_v25, %v113_v26 }
 0x184   :  { %v122_v28 = vsub.f32 0.0, %v121_v27 }
 0x186   :  { %v123_v29 = vmul.f32 1.442695, %v122_v28 }
 0x188   :  { %160 = vpow2.f32 %v123_v29 }
 0x18e   :  { %v161_v30 = vpop.eup %160 }
 0x18f   :  { %v125_v31 = vadd.f32 1.0, %v161_v30 }
 0x191   :  { %162 = vrcp.f32 %v125_v31 }
 0x197   :  { %v163_v34 = vpop.eup %162 }
 0x198   :  { %v130_v35 = vperm.slane %v163_v34, %v129_v33 }
 0x19a   :  { %133 = vst.msk [vmem:[#allocation3] sm:$0x1] %vm132_vm5, %v130_v35 }
 0x19b   :  { %144 = dma.vmem_to_hbm [thread:$0]  %s140_s4, 16, %s142_s26, [#allocation4]  }
 0x19c   :  { %188 = dma.done.wait [#allocation4], 16  }
 0x19d   :  { %189 = vsyncadd [#allocation4], 4294967280 }
 0x19e   :  { %149 = vsyncpa [#allocation4], 1 }

</bundles_post_ra>
